<compile_context>
chip_gen: v7x
topology: tpu7x:2x2x1
jax: 0.10.0
libtpu: 0.0.40
codegen_flags: <defaults>
</compile_context>

<pallas_src>
import functools

import jax
import jax.numpy as jnp
from jax.experimental import pallas as pl
from jax.experimental.pallas import tpu as pltpu


# --------------------------------------------------------------------------
# Kernels
# --------------------------------------------------------------------------
def _pooler_kernel(x_ref, wt_ref, b_ref, o_ref):
    # x_ref : [tb, H]   first-token activations (cols [0, H) of the [B, S*H] view)
    # wt_ref: [H, tn]   pre-transposed weight, [in, out] layout
    # b_ref : [1, tn]   bias (float32)
    # o_ref : [tb, tn]  pooled-output tile
    wt = wt_ref[...]
    x = x_ref[...].astype(wt.dtype)
    y = jnp.dot(x, wt, preferred_element_type=jnp.float32)   # MXU, f32 accum
    y = y + b_ref[...]                                        # bias in f32
    o_ref[...] = jnp.tanh(y).astype(o_ref.dtype)              # tanh in f32


def _pooler_kernel_whole(x_ref, wt_ref, b_ref, o_ref):
    # Fallback for shapes that cannot be tiled legally (tiny / unaligned H):
    # whole arrays live in VMEM, slice token 0 in-kernel.
    wt = wt_ref[...]
    x = x_ref[:, 0, :].astype(wt.dtype)
    y = jnp.dot(x, wt, preferred_element_type=jnp.float32)
    o_ref[...] = jnp.tanh(y + b_ref[...]).astype(o_ref.dtype)


# --------------------------------------------------------------------------
# Tiling helpers
# --------------------------------------------------------------------------
def _vmem_capacity_bytes():
    try:
        cap = getattr(pltpu.get_tpu_info(), "vmem_capacity_bytes", None)
        if cap:
            return int(cap)
    except Exception:
        pass
    return 64 * 1024 * 1024   # conservative default (v7x per-core VMEM)


def _divisor_tiles(dim, align, cap=None):
    """Divisors of `dim` that are multiples of `align`, descending.
    Falls back to [dim] if `dim` is not a multiple of `align` (full-dim block
    is always layout-legal)."""
    if dim % align != 0:
        return [dim]
    hi = dim if cap is None else min(dim, cap)
    tiles = [t for t in range(align, hi + 1, align) if dim % t == 0]
    if not tiles:
        tiles = [align]
    return sorted(tiles, reverse=True)


# --------------------------------------------------------------------------
# Wrapper
# --------------------------------------------------------------------------
def roformer_pooler(hidden_states, weight_t, bias, *, out_dtype=None,
                    block_b=None, block_n=None):
    """Pallas TPU RoFormerPooler: tanh(hidden_states[:, 0] @ W.T + bias).

    hidden_states: [B, S, H]
    weight_t     : [H, H] = W.T — the nn.Linear weight transposed ONCE at
                   parameter-load time to [in, out] layout (pass bf16 for the
                   fast MXU / half-bandwidth path).
    bias         : [H]
    """
    B, S, H = hidden_states.shape
    assert weight_t.shape == (H, H) and bias.shape == (H,)
    if out_dtype is None:
        out_dtype = hidden_states.dtype

    x_item = jnp.dtype(hidden_states.dtype).itemsize
    w_item = jnp.dtype(weight_t.dtype).itemsize
    o_item = jnp.dtype(out_dtype).itemsize
    b2 = bias.reshape(1, H).astype(jnp.float32)

    flops = 2 * B * H * H
    trans = B * H

    # ---- Fallback: H not lane-aligned while S > 1 (tiny test shapes). -----
    if H % 128 != 0 and S != 1:
        cost = pl.CostEstimate(
            flops=flops, transcendentals=trans,
            bytes_accessed=(B * S * H * x_item + H * H * w_item + H * 4
                            + B * H * o_item))
        return pl.pallas_call(
            _pooler_kernel_whole,
            out_shape=jax.ShapeDtypeStruct((B, H), out_dtype),
            cost_estimate=cost,
        )(hidden_states, weight_t, b2)

    # ---- Main path: dense 2-D first-token view. ----------------------------
    x2 = hidden_states.reshape(B, S * H)   # free (row-major) reshape

    vmem_cap = _vmem_capacity_bytes()
    budget = vmem_cap // 2                 # leave headroom for pipeline/scratch

    tb_pref = block_b if block_b is not None else (256 if B >= 256 else 128)
    tb_tiles = _divisor_tiles(B, 8, cap=tb_pref)
    tn_tiles = _divisor_tiles(H, 128, cap=block_n)   # no cap -> up to full H

    def footprint(tb, tn):
        # Double-buffered blocks; the (1, tn) bias block sublane-pads to 8.
        return 2 * (tb * H * x_item + H * tn * w_item
                    + 8 * tn * 4 + tb * tn * o_item)

    tb, tn = tb_tiles[-1], tn_tiles[-1]    # smallest tiles as safe default
    chosen = False
    for tn_c in tn_tiles:                  # prefer the largest weight tile:
        for tb_c in tb_tiles:              # tn == H => full-weight residency
            if footprint(tb_c, tn_c) <= budget:
                tb, tn, chosen = tb_c, tn_c, True
                break
        if chosen:
            break

    nb, nn = B // tb, H // tn

    # Loop order by total HBM traffic (this op is HBM-bandwidth bound):
    # N-outer re-fetches the x block nn times; B-outer re-fetches W nb times.
    n_outer_bytes = nn * B * H * x_item + H * H * w_item
    b_outer_bytes = B * H * x_item + nb * H * H * w_item

    if n_outer_bytes <= b_outer_bytes:
        grid = (nn, nb)                                    # N outer, B inner
        x_spec = pl.BlockSpec((tb, H), lambda j, i: (i, 0))
        w_spec = pl.BlockSpec((H, tn), lambda j, i: (0, j))
        b_spec = pl.BlockSpec((1, tn), lambda j, i: (0, j))
        o_spec = pl.BlockSpec((tb, tn), lambda j, i: (i, j))
        bytes_accessed = n_outer_bytes
    else:
        grid = (nb, nn)                                    # B outer, N inner
        x_spec = pl.BlockSpec((tb, H), lambda i, j: (i, 0))
        w_spec = pl.BlockSpec((H, tn), lambda i, j: (0, j))
        b_spec = pl.BlockSpec((1, tn), lambda i, j: (0, j))
        o_spec = pl.BlockSpec((tb, tn), lambda i, j: (i, j))
        bytes_accessed = b_outer_bytes
    bytes_accessed += H * 4 + B * H * o_item               # bias + output

    cost = pl.CostEstimate(flops=flops, transcendentals=trans,
                           bytes_accessed=int(bytes_accessed))

    vmem_limit = int(min(vmem_cap - (2 << 20),
                         max(32 << 20, footprint(tb, tn) + (8 << 20))))

    return pl.pallas_call(
        _pooler_kernel,
        out_shape=jax.ShapeDtypeStruct((B, H), out_dtype),
        grid_spec=pl.GridSpec(
            grid=grid,
            in_specs=[x_spec, w_spec, b_spec],
            out_specs=o_spec,
        ),
        compiler_params=pltpu.CompilerParams(
            # Both axes independent (K = H is not tiled, no accumulator).
            # The traffic-minimal order puts the dominant stream outermost,
            # so v7x megacore sharding splits it disjointly across cores.
            dimension_semantics=("parallel", "parallel"),
            vmem_limit_bytes=vmem_limit,
        ),
        cost_estimate=cost,
    )(x2, weight_t, b2)


# --------------------------------------------------------------------------
# Reference + tests
# --------------------------------------------------------------------------
def reference_pooler(hidden_states, weight, bias):
    # weight in nn.Linear [out, in] layout; f32 math.
    x = hidden_states[:, 0, :].astype(jnp.float32)
    return jnp.tanh(x @ weight.astype(jnp.float32).T + bias.astype(jnp.float32))


if __name__ == "__main__":
    key = jax.random.PRNGKey(0)
    k_x, k_w, k_b, k_x2 = jax.random.split(key, 4)

    pooler = jax.jit(roformer_pooler,
                     static_argnames=("out_dtype", "block_b", "block_n"))

    # ---- Test 1: small aligned shapes, f32 (main path, grid (1,1)). -------
    B, S, H = 8, 8, 128
    hidden = jax.random.normal(k_x, (B, S, H), dtype=jnp.float32)
    weight = jax.random.normal(k_w, (H, H), dtype=jnp.float32) / jnp.sqrt(H)
    bias = jax.random.normal(k_b, (H,), dtype=jnp.float32) * 0.01
    weight_t = jnp.asarray(weight.T)            # one-time param-load transpose

    ref = reference_pooler(hidden, weight, bias)
    out = jax.block_until_ready(pooler(hidden, weight_t, bias))
    assert out.shape == (B, H)
    assert jnp.allclose(out, ref, atol=1e-5, rtol=1e-5), "f32 mismatch"

    # ---- Test 2: bf16 weight fast path (one-time cast), f32 activations. --
    wt_bf16 = weight_t.astype(jnp.bfloat16)
    out_bf = jax.block_until_ready(pooler(hidden, wt_bf16, bias))
    assert jnp.allclose(out_bf.astype(jnp.float32), ref, atol=2e-2, rtol=2e-2), \
        "bf16-weight mismatch"

    # ---- Test 3: multi-tile grid (forced small tiles), bf16 activations. --
    B2, S2, H2 = 64, 16, 512
    hid2 = jax.random.normal(k_x2, (B2, S2, H2), dtype=jnp.float32)
    w2 = jax.random.normal(k_w, (H2, H2), dtype=jnp.float32) / jnp.sqrt(H2)
    b2 = jax.random.normal(k_b, (H2,), dtype=jnp.float32) * 0.01
    hid2_bf = hid2.astype(jnp.bfloat16)
    w2t_bf = jnp.asarray(w2.T).astype(jnp.bfloat16)
    ref2 = reference_pooler(hid2_bf.astype(jnp.float32),
                            w2t_bf.astype(jnp.float32).T, b2)
    out2 = jax.block_until_ready(
        pooler(hid2_bf, w2t_bf, b2, block_b=8, block_n=128))
    assert out2.shape == (B2, H2)
    assert jnp.allclose(out2.astype(jnp.float32), ref2, atol=2e-2, rtol=2e-2), \
        "tiled-grid mismatch"

    # ---- Test 4: unaligned tiny shape -> whole-array fallback path. -------
    B3, S3, H3 = 2, 8, 32
    hid3 = jax.random.normal(k_x, (B3, S3, H3), dtype=jnp.float32)
    w3 = jax.random.normal(k_w, (H3, H3), dtype=jnp.float32) / jnp.sqrt(H3)
    b3 = jax.random.normal(k_b, (H3,), dtype=jnp.float32) * 0.01
    ref3 = reference_pooler(hid3, w3, b3)
    out3 = jax.block_until_ready(pooler(hid3, jnp.asarray(w3.T), b3))
    assert out3.shape == (B3, H3)
    assert jnp.allclose(out3, ref3, atol=1e-5, rtol=1e-5), "fallback mismatch"

    print("KERNEL_OK")
</pallas_src>

<mosaic_0001>
module attributes {stable_mosaic.version = 11 : i64} {
  func.func @_pooler_kernel(%arg0: i32, %arg1: i32, %arg2: memref<8x128xf32, #tpu.memory_space<vmem>>, %arg3: memref<128x128xf32, #tpu.memory_space<vmem>>, %arg4: memref<1x128xf32, #tpu.memory_space<vmem>>, %arg5: memref<8x128xf32, #tpu.memory_space<vmem>>) attributes {dimension_semantics = [#tpu.dimension_semantics<parallel>, #tpu.dimension_semantics<parallel>], iteration_bounds = array<i64: 1, 1>, scalar_prefetch = 0 : i64, scratch_operands = 0 : i64, tpu.core_type = #tpu.core_type<tc>, window_params = [{transform_indices = @transform_0, window_bounds = array<i64: 8, 128>}, {transform_indices = @transform_1, window_bounds = array<i64: 128, 128>}, {transform_indices = @transform_2, window_bounds = array<i64: 1, 128>}, {transform_indices = @transform_3, window_bounds = array<i64: 8, 128>}]} {
    %c0 = arith.constant 0 : index
    %c0_0 = arith.constant 0 : index
    %0 = vector.load %arg3[%c0, %c0_0] : memref<128x128xf32, #tpu.memory_space<vmem>>, vector<128x128xf32>
    %c0_1 = arith.constant 0 : index
    %c0_2 = arith.constant 0 : index
    %1 = vector.load %arg2[%c0_1, %c0_2] : memref<8x128xf32, #tpu.memory_space<vmem>>, vector<8x128xf32>
    %cst = arith.constant dense<0.000000e+00> : vector<8x128xf32>
    %2 = tpu.matmul %1, %0, %cst {dimension_numbers = #tpu.dot_dimension_numbers<[1], [0], [0], [1], [0, 0, 1, 1], [], []>} : vector<8x128xf32>, vector<128x128xf32>, vector<8x128xf32> -> vector<8x128xf32>
    %c0_3 = arith.constant 0 : index
    %c0_4 = arith.constant 0 : index
    %3 = vector.load %arg4[%c0_3, %c0_4] : memref<1x128xf32, #tpu.memory_space<vmem>>, vector<1x128xf32>
    %4 = vector.broadcast %3 : vector<1x128xf32> to vector<8x128xf32>
    %5 = arith.addf %2, %4 : vector<8x128xf32>
    %6 = math.tanh %5 : vector<8x128xf32>
    %c0_5 = arith.constant 0 : index
    %c0_6 = arith.constant 0 : index
    %7 = vector.load %arg5[%c0_5, %c0_6] : memref<8x128xf32, #tpu.memory_space<vmem>>, vector<8x128xf32>
    tpu.vector_store %arg5[%c0_5, %c0_6], %6 {strides = array<i32>} : memref<8x128xf32, #tpu.memory_space<vmem>>, vector<8x128xf32>,
    return
  }
  func.func @transform_0(%arg0: i32, %arg1: i32) -> (i32, i32) {
    %c0_i32 = arith.constant 0 : i32
    %c0_i32_0 = arith.constant 0 : i32
    return %arg1, %c0_i32 : i32, i32
  }
  func.func @transform_1(%arg0: i32, %arg1: i32) -> (i32, i32) {
    %c0_i32 = arith.constant 0 : i32
    %c0_i32_0 = arith.constant 0 : i32
    return %c0_i32, %arg0 : i32, i32
  }
  func.func @transform_2(%arg0: i32, %arg1: i32) -> (i32, i32) {
    %c0_i32 = arith.constant 0 : i32
    %c0_i32_0 = arith.constant 0 : i32
    return %c0_i32, %arg0 : i32, i32
  }
  func.func @transform_3(%arg0: i32, %arg1: i32) -> (i32, i32) {
    %c0_i32 = arith.constant 0 : i32
    return %arg1, %arg0 : i32, i32
  }
}

</mosaic_0001>

<bundles_post_ra>
// kernel: roformer_pooler.1
= control target key start
LH: loop header
LB: loop body
LE: loop exit
PB: predicated region body
PF: predicated region fallthrough
CT: control target
= control target key end

     0   :  { %v232_v3 = vmov 0.0|0.0   ;;  %vm233_vm0 = vmmov 0   ;;  %v234_v6 = vmov 0.0   ;;  %s322_s0 = inlined_call_operand.vmem [shape: f32[8,1024], index: 0, kind: input, shape index: {}]   ;;  %s323_s1 = inlined_call_operand.vmem [shape: f32[128,128], index: 1, kind: input, shape index: {}]   ;;  %s324_s2 = inlined_call_operand.vmem [shape: f32[1,128], index: 2, kind: input, shape index: {}]   ;;  %s325_s3 = inlined_call_operand.hbm [shape: f32[8,128], index: 3, kind: output, shape index: {}]  }
   0x1   :  { %v15_v0 = vld [vmem:[%s323_s1] sm:$0xff]  ;;  %v16_v1 = vld [vmem:[%s323_s1 + $0x8] sm:$0xff]  ;;  %v17_v2 = vld [vmem:[%s323_s1 + $0x10] sm:$0xff]  ;;  %178 = vmatprep.subr.bf16.mxu0 %v232_v3  ;;  %175 = vmatprep.mubr.msk.f32.mxu0 %vm233_vm0, %v234_v6 }
   0x2   :  { %v179_v4 = vpack.c.bf16 %v16_v1, %v15_v0  ;;  %v18_v5 = vld [vmem:[%s323_s1 + $0x18] sm:$0xff]  ;;  %v19_v8 = vld [vmem:[%s323_s1 + $0x20] sm:$0xff]  ;;  %v20_v9 = vld [vmem:[%s323_s1 + $0x28] sm:$0xff] }
   0x3   :  { %v182_v7 = vpack.c.bf16 %v18_v5, %v17_v2 }
   0x4   :  { %180 = vmatpush3.bf16.msra.mxu0 %v179_v4 }
   0x5   :  { %181 = vmatprep.subr.bf16.mxu0 %v232_v3 }
   0x6   :  { %8 = vsyncpa [#allocation3], 0  ;;  %v185_v10 = vpack.c.bf16 %v20_v9, %v19_v8  ;;  %v21_v11 = vld [vmem:[%s323_s1 + $0x30] sm:$0xff]  ;;  %v22_v12 = vld [vmem:[%s323_s1 + $0x38] sm:$0xff]  ;;  %s235_s21 = smov [#allocation2]  }
   0x7   :  { %v188_v13 = vpack.c.bf16 %v22_v12, %v21_v11  ;;  %v23_v14 = vld [vmem:[%s323_s1 + $0x40] sm:$0xff]  ;;  %v24_v15 = vld [vmem:[%s323_s1 + $0x48] sm:$0xff]  ;;  %v25_v17 = vld [vmem:[%s323_s1 + $0x50] sm:$0xff]  ;;  %s117_s22 = sshll.u32 %s235_s21, 4  ;;  %s118_s22 = int_to_ptr.vmem [resolvable:$true] %s117_s22 }
   0x8   :  { %183 = vmatpush3.bf16.msra.mxu0 %v182_v7  ;;  %v191_v16 = vpack.c.bf16 %v24_v15, %v23_v14  ;;  %v26_v18 = vld [vmem:[%s323_s1 + $0x58] sm:$0xff]  ;;  %v27_v20 = vld [vmem:[%s323_s1 + $0x60] sm:$0xff]  ;;  %v28_v21 = vld [vmem:[%s323_s1 + $0x68] sm:$0xff]  ;;  %p213_p1 = scmp.lt.s32.totalorder %s118_s22, %s118_s22 }
   0x9   :  { %184 = vmatprep.subr.bf16.mxu0 %v232_v3  ;;  %v194_v19 = vpack.c.bf16 %v26_v18, %v25_v17  ;;  %v197_v22 = vpack.c.bf16 %v28_v21, %v27_v20  ;;  %v29_v23 = vld [vmem:[%s323_s1 + $0x70] sm:$0xff]  ;;  %v30_v24 = vld [vmem:[%s323_s1 + $0x78] sm:$0xff]  ;;  %v31_v26 = vld [vmem:[%s322_s0] sm:$0xff]  ;;  %s208_s1 = scalar_lea.vmem %s118_s22, 128 }
   0xa   :  { %v200_v25 = vpack.c.bf16 %v30_v24, %v29_v23  ;;  %v125_v27 = vld [vmem:[%s324_s2] ss:$0 sm:$0xff]  ;;  %p209_p0 = scmp.ne.s32.totalorder %s118_s22, %s208_s1  ;;  %p214_p2 = scmp.lt.s32.totalorder %s208_s1, %s208_s1 }
   0xc   :  { %186 = vmatpush3.bf16.msra.mxu0 %v185_v10  ;;  %p215_p3 = por %p214_p2, %p213_p1 }
   0xd   :  { %187 = vmatprep.subr.bf16.mxu0 %v232_v3 }
   0xe   :  { %p216_p4 = pnand %p215_p3, %p209_p0 }
  0x10   :  { %189 = vmatpush3.bf16.msra.mxu0 %v188_v13 }
  0x11   :  { %190 = vmatprep.subr.bf16.mxu0 %v232_v3 }
  0x14   :  { %192 = vmatpush3.bf16.msra.mxu0 %v191_v16 }
  0x15   :  { %193 = vmatprep.subr.bf16.mxu0 %v232_v3 }
  0x18   :  { %195 = vmatpush3.bf16.msra.mxu0 %v194_v19 }
  0x19   :  { %196 = vmatprep.subr.bf16.mxu0 %v232_v3 }
  0x1c   :  { %198 = vmatpush3.bf16.msra.mxu0 %v197_v22 }
  0x1d   :  { %199 = vmatprep.subr.bf16.mxu0 %v232_v3 }
  0x20   :  { %201 = vmatpush3.bf16.msra.mxu0 %v200_v25 }
  0x23   :  { %176 = vmatmul.mubr.f32.vlgmr.msra.gmra.mrb[0].mxu0 %v31_v26 }
  0xf6   :  { %v105_v28 = vpop.f32.mrb[0].mxu0 }
  0xf7   :  { %v106_v29 = vadd.f32 %v125_v27, %v105_v28  ;;  %v177_v30 = vpop.f32.mrb[1].mxu0 }
  0xf9   :  { %206 = vtanh.f32 %v106_v29 }
 0x103   :  { %v207_v31 = vpop.eup %206 }
 0x104   :  { %110 = vst [vmem:[#allocation2] sm:$0xff] %v207_v31 }
 0x105   :  { %219 = shalt.err (!%p216_p4)
}
 0x106   :  { %s220_s2 = scalar_lea.hbm %s325_s3, 128 }
 0x107   :  { %p221_p5 = scmp.ne.s32.totalorder %s325_s3, %s220_s2  ;;  %p224_p6 = scmp.lt.u32.totalorder %s220_s2, %s325_s3 }
 0x109   :  { %p226_p7 = pnand %p224_p6, %p221_p5 }
 0x10b   :  { %229 = shalt.err (!%p226_p7)
}
 0x10c   :  { %120 = dma.vmem_to_hbm [thread:$0]  %s118_s22, 128, %s325_s3, [#allocation3]  }
 0x10d   :  { %230 = dma.done.wait [#allocation3], 128  }
 0x10e   :  { %231 = vsyncadd [#allocation3], 4294967168 }
 0x10f   :  { %124 = vsyncpa [#allocation3], 1 }

</bundles_post_ra>
